<compile_context>
chip_gen: v7x
topology: tpu7x:2x2x1
jax: 0.10.0
libtpu: 0.0.40
codegen_flags: <defaults>
</compile_context>

<pallas_src>
import functools
import math

import jax
import jax.numpy as jnp
from jax.experimental import pallas as pl
from jax.experimental.pallas import tpu as pltpu

LANE = 128
# v7x has only 64 MiB of VMEM (v5e/v6e: 128 MiB); keep resident-operand
# tilings under this budget so the same code is safe on all generations.
VMEM_BUDGET_BYTES = 40 * 1024 * 1024
VMEM_LIMIT_BYTES = 48 * 1024 * 1024


def _round_up(x, m):
    return ((x + m - 1) // m) * m


def _pad2(a, rows, cols, dtype):
    """Zero-pad a 2-D array to (rows, cols) and cast."""
    out = jnp.zeros((rows, cols), dtype)
    return out.at[: a.shape[0], : a.shape[1]].set(a.astype(dtype))


def _pick_row_tile(n128):
    """Row-tile size: as large as practical, but keep >= 2 row tiles when
    possible so the 'parallel' axis can split across v7x's two TensorCores."""
    if n128 >= 1024:
        return 512
    if n128 >= 512:
        return 256
    return 128


# ---------------------------------------------------------------------------
# support = x @ W   (hoisted out of the aggregation kernel; computed once)
# ---------------------------------------------------------------------------
def _support_kernel(x_ref, w_ref, out_ref):
    out_ref[...] = jnp.dot(
        x_ref[...], w_ref[...], preferred_element_type=jnp.float32
    ).astype(out_ref.dtype)


def _support_matmul(x_p, w_p, *, tm):
    """Tiled support matmul: (n_pad, f_pad) @ (f_pad, h) -> bf16 (n_pad, h)."""
    n_pad, f_pad = x_p.shape
    h = w_p.shape[1]
    flops = 2 * n_pad * f_pad * h
    bytes_accessed = x_p.size * 2 + w_p.size * 2 + n_pad * h * 2
    return pl.pallas_call(
        _support_kernel,
        out_shape=jax.ShapeDtypeStruct((n_pad, h), jnp.bfloat16),
        grid_spec=pltpu.PrefetchScalarGridSpec(
            num_scalar_prefetch=0,
            grid=(n_pad // tm,),
            in_specs=[
                pl.BlockSpec((tm, f_pad), lambda i: (i, 0)),   # x row strip
                pl.BlockSpec((f_pad, h), lambda i: (0, 0)),    # W resident
            ],
            out_specs=pl.BlockSpec((tm, h), lambda i: (i, 0)),
        ),
        compiler_params=pltpu.CompilerParams(
            dimension_semantics=("parallel",),
            vmem_limit_bytes=VMEM_LIMIT_BYTES,
        ),
        cost_estimate=pl.CostEstimate(
            flops=int(flops), transcendentals=0,
            bytes_accessed=int(bytes_accessed)),
    )(x_p, w_p)


# ---------------------------------------------------------------------------
# aggregate: out = adj @ support + b   (+ optional ReLU)
# ---------------------------------------------------------------------------
def _agg_resident_kernel(adj_ref, s_ref, b_ref, out_ref, *, relu):
    """Support fully VMEM-resident; one MXU matmul per row strip."""
    h = jnp.dot(adj_ref[...], s_ref[...], preferred_element_type=jnp.float32)
    h = h + b_ref[...]                       # bias add in f32
    if relu:
        h = jnp.maximum(h, 0.0)              # ReLU in f32 (v5e: no bf16 VPU)
    out_ref[...] = h.astype(out_ref.dtype)


def _agg_streamed_kernel(adj_ref, s_ref, b_ref, out_ref, acc_ref, *, relu):
    """Fallback: support streamed along a reduction axis, f32 accumulator."""
    k = pl.program_id(1)

    @pl.when(k == 0)
    def _():
        acc_ref[...] = jnp.zeros_like(acc_ref)

    acc_ref[...] += jnp.dot(
        adj_ref[...], s_ref[...], preferred_element_type=jnp.float32)

    @pl.when(k == pl.num_programs(1) - 1)
    def _():
        h = acc_ref[...] + b_ref[...]
        if relu:
            h = jnp.maximum(h, 0.0)
        out_ref[...] = h.astype(out_ref.dtype)


def _aggregate(adj_p, s_p, b_p, *, relu, out_dtype, tm):
    n_pad = adj_p.shape[0]
    h = s_p.shape[1]
    out_bytes = jnp.dtype(out_dtype).itemsize
    n_rows = n_pad // tm
    kernel_flops = 2 * n_pad * n_pad * h

    # VMEM footprint of the fully-resident-support variant.
    resident_bytes = (
        2 * tm * n_pad * 2        # double-buffered adj row strips (bf16)
        + n_pad * h * 2           # resident support (bf16)
        + 2 * tm * h * out_bytes  # double-buffered output tiles
        + tm * h * 4)             # f32 matmul result / staging

    if resident_bytes <= VMEM_BUDGET_BYTES:
        # Support / bias DMA'd once and kept resident; grid is rows only.
        bytes_accessed = (adj_p.size * 2 + s_p.size * 2 + b_p.size * 4
                          + n_pad * h * out_bytes)
        kernel = functools.partial(_agg_resident_kernel, relu=relu)
        return pl.pallas_call(
            kernel,
            out_shape=jax.ShapeDtypeStruct((n_pad, h), out_dtype),
            grid_spec=pltpu.PrefetchScalarGridSpec(
                num_scalar_prefetch=0,
                grid=(n_rows,),
                in_specs=[
                    pl.BlockSpec((tm, n_pad), lambda i: (i, 0)),  # adj row strip
                    pl.BlockSpec((n_pad, h), lambda i: (0, 0)),   # support resident
                    pl.BlockSpec((1, h), lambda i: (0, 0)),       # bias resident
                ],
                out_specs=pl.BlockSpec((tm, h), lambda i: (i, 0)),
            ),
            compiler_params=pltpu.CompilerParams(
                dimension_semantics=("parallel",),
                vmem_limit_bytes=VMEM_LIMIT_BYTES,
            ),
            cost_estimate=pl.CostEstimate(
                flops=int(kernel_flops), transcendentals=0,
                bytes_accessed=int(bytes_accessed)),
        )(adj_p, s_p, b_p)

    # Streamed fallback for very large graphs: grid = (rows, K), large tm
    # preferred (halves the support re-read term), f32 VMEM accumulator.
    tk = tm
    n_k = n_pad // tk
    bytes_accessed = (adj_p.size * 2 + s_p.size * 2 * n_rows + b_p.size * 4
                      + n_pad * h * out_bytes)
    kernel = functools.partial(_agg_streamed_kernel, relu=relu)
    return pl.pallas_call(
        kernel,
        out_shape=jax.ShapeDtypeStruct((n_pad, h), out_dtype),
        grid_spec=pltpu.PrefetchScalarGridSpec(
            num_scalar_prefetch=0,
            grid=(n_rows, n_k),
            in_specs=[
                pl.BlockSpec((tm, tk), lambda i, k: (i, k)),   # adj tile
                pl.BlockSpec((tk, h), lambda i, k: (k, 0)),    # support tile
                pl.BlockSpec((1, h), lambda i, k: (0, 0)),     # bias resident
            ],
            out_specs=pl.BlockSpec((tm, h), lambda i, k: (i, 0)),
            scratch_shapes=[pltpu.VMEM((tm, h), jnp.float32)],
        ),
        compiler_params=pltpu.CompilerParams(
            dimension_semantics=("parallel", "arbitrary"),
            vmem_limit_bytes=VMEM_LIMIT_BYTES,
        ),
        cost_estimate=pl.CostEstimate(
            flops=int(kernel_flops), transcendentals=0,
            bytes_accessed=int(bytes_accessed)),
    )(adj_p, s_p, b_p)


# ---------------------------------------------------------------------------
# Full 2-layer GCN forward
# ---------------------------------------------------------------------------
def gcn_forward(x, adj, w1, b1, w2, b2):
    """2-layer GCN forward (eval mode). Returns (N, nclass) float32."""
    n, nfeat = x.shape
    nhid = w1.shape[1]
    nclass = w2.shape[1]

    # Lane-dense widths: pad feature / hidden / class dims to multiples of 128.
    f_pad = _round_up(nfeat, LANE)
    h_pad = _round_up(nhid, LANE)
    c_pad = _round_up(nclass, LANE)
    # Row tile and node-count padding (n_pad divisible by tm).
    tm = _pick_row_tile(_round_up(n, LANE))
    n_pad = _round_up(n, tm)

    # Zero-padded, MXU-friendly operands.  Zero adj rows/cols and zero weight
    # rows/columns guarantee padded lanes/rows never contaminate real outputs.
    adj_p = _pad2(adj, n_pad, n_pad, jnp.bfloat16)
    x_p = _pad2(x, n_pad, f_pad, jnp.bfloat16)
    w1_p = _pad2(w1, f_pad, h_pad, jnp.bfloat16)
    b1_p = _pad2(b1.reshape(1, -1), 1, h_pad, jnp.float32)
    w2_p = _pad2(w2, h_pad, c_pad, jnp.bfloat16)
    b2_p = _pad2(b2.reshape(1, -1), 1, c_pad, jnp.float32)

    # Layer 1: h1 = relu(adj @ (x @ W1) + b1), kept bf16 for the next layer.
    s1 = _support_matmul(x_p, w1_p, tm=tm)
    h1 = _aggregate(adj_p, s1, b1_p, relu=True, out_dtype=jnp.bfloat16, tm=tm)
    # TODO(synk): dropout omitted (eval-mode identity).
    # Layer 2: out = adj @ (h1 @ W2) + b2, f32 output.
    s2 = _support_matmul(h1, w2_p, tm=tm)
    out_p = _aggregate(adj_p, s2, b2_p, relu=False, out_dtype=jnp.float32, tm=tm)

    return out_p[:n, :nclass]


def init_gc_params(key, in_features, out_features):
    """Match GraphConvolution.reset_parameters: U(-stdv, stdv), stdv=1/sqrt(out)."""
    stdv = 1.0 / math.sqrt(out_features)
    kw, kb = jax.random.split(key)
    w = jax.random.uniform(kw, (in_features, out_features),
                           minval=-stdv, maxval=stdv, dtype=jnp.float32)
    b = jax.random.uniform(kb, (out_features,),
                           minval=-stdv, maxval=stdv, dtype=jnp.float32)
    return w, b


if __name__ == "__main__":
    # Small shapes consistent with the module's forward.
    N, nfeat, nhid, nclass = 64, 32, 32, 16

    key = jax.random.PRNGKey(0)
    k_x, k_adj, k_g1, k_g2 = jax.random.split(key, 4)

    # Node features.
    x = jax.random.normal(k_x, (N, nfeat), dtype=jnp.float32)

    # Dense symmetric row-normalized adjacency (what torch.spmm consumes).
    a = (jax.random.uniform(k_adj, (N, N)) < 0.1).astype(jnp.float32)
    a = jnp.maximum(a, a.T) + jnp.eye(N, dtype=jnp.float32)
    adj = a / jnp.sum(a, axis=1, keepdims=True)

    # Deterministic parameter init (same shapes as GraphConvolution).
    w1, b1 = init_gc_params(k_g1, nfeat, nhid)
    w2, b2 = init_gc_params(k_g2, nhid, nclass)

    out = jax.jit(gcn_forward)(x, adj, w1, b1, w2, b2)
    jax.block_until_ready(out)

    # Cross-check against plain f32 JAX reference (kernel uses bf16 MXU inputs
    # with f32 accumulation, so allow a small tolerance).
    h1_ref = jnp.maximum(adj @ (x @ w1) + b1, 0.0)
    out_ref = adj @ (h1_ref @ w2) + b2
    assert out.shape == (N, nclass)
    assert jnp.allclose(out, out_ref, atol=2e-2, rtol=2e-2), float(
        jnp.max(jnp.abs(out - out_ref)))

    print("KERNEL_OK")
</pallas_src>

<mosaic_0001>
module attributes {stable_mosaic.version = 11 : i64} {
  func.func @_support_kernel(%arg0: i32, %arg1: memref<128x128xbf16, #tpu.memory_space<vmem>>, %arg2: memref<128x128xbf16, #tpu.memory_space<vmem>>, %arg3: memref<128x128xbf16, #tpu.memory_space<vmem>>) attributes {dimension_semantics = [#tpu.dimension_semantics<parallel>], iteration_bounds = array<i64: 1>, scalar_prefetch = 0 : i64, scratch_operands = 0 : i64, tpu.core_type = #tpu.core_type<tc>, window_params = [{transform_indices = @transform_0, window_bounds = array<i64: 128, 128>}, {pipeline_mode = #tpu.pipeline_mode<synchronous>, transform_indices = @transform_1, window_bounds = array<i64: 128, 128>}, {transform_indices = @transform_2, window_bounds = array<i64: 128, 128>}]} {
    %c0 = arith.constant 0 : index
    %c0_0 = arith.constant 0 : index
    %0 = vector.load %arg1[%c0, %c0_0] : memref<128x128xbf16, #tpu.memory_space<vmem>>, vector<128x128xbf16>
    %c0_1 = arith.constant 0 : index
    %c0_2 = arith.constant 0 : index
    %1 = vector.load %arg2[%c0_1, %c0_2] : memref<128x128xbf16, #tpu.memory_space<vmem>>, vector<128x128xbf16>
    %cst = arith.constant dense<0.000000e+00> : vector<128x128xf32>
    %2 = tpu.matmul %0, %1, %cst {dimension_numbers = #tpu.dot_dimension_numbers<[1], [0], [0], [1], [0, 0, 1, 1], [], []>} : vector<128x128xbf16>, vector<128x128xbf16>, vector<128x128xf32> -> vector<128x128xf32>
    %3 = arith.truncf %2 : vector<128x128xf32> to vector<128x128xbf16>
    %c0_3 = arith.constant 0 : index
    %c0_4 = arith.constant 0 : index
    %4 = vector.load %arg3[%c0_3, %c0_4] : memref<128x128xbf16, #tpu.memory_space<vmem>>, vector<128x128xbf16>
    tpu.vector_store %arg3[%c0_3, %c0_4], %3 {strides = array<i32>} : memref<128x128xbf16, #tpu.memory_space<vmem>>, vector<128x128xbf16>,
    return
  }
  func.func @transform_0(%arg0: i32) -> (i32, i32) {
    %c0_i32 = arith.constant 0 : i32
    %c0_i32_0 = arith.constant 0 : i32
    return %arg0, %c0_i32 : i32, i32
  }
  func.func @transform_1(%arg0: i32) -> (i32, i32) {
    %c0_i32 = arith.constant 0 : i32
    %c0_i32_0 = arith.constant 0 : i32
    %c0_i32_1 = arith.constant 0 : i32
    return %c0_i32, %c0_i32_0 : i32, i32
  }
  func.func @transform_2(%arg0: i32) -> (i32, i32) {
    %c0_i32 = arith.constant 0 : i32
    %c0_i32_0 = arith.constant 0 : i32
    return %arg0, %c0_i32 : i32, i32
  }
}

module attributes {stable_mosaic.version = 11 : i64} {
  func.func @_agg_resident_kernel(%arg0: i32, %arg1: memref<128x128xbf16, #tpu.memory_space<vmem>>, %arg2: memref<128x128xbf16, #tpu.memory_space<vmem>>, %arg3: memref<1x128xf32, #tpu.memory_space<vmem>>, %arg4: memref<128x128xbf16, #tpu.memory_space<vmem>>) attributes {dimension_semantics = [#tpu.dimension_semantics<parallel>], iteration_bounds = array<i64: 1>, scalar_prefetch = 0 : i64, scratch_operands = 0 : i64, tpu.core_type = #tpu.core_type<tc>, window_params = [{transform_indices = @transform_0, window_bounds = array<i64: 128, 128>}, {pipeline_mode = #tpu.pipeline_mode<synchronous>, transform_indices = @transform_1, window_bounds = array<i64: 128, 128>}, {pipeline_mode = #tpu.pipeline_mode<synchronous>, transform_indices = @transform_2, window_bounds = array<i64: 1, 128>}, {transform_indices = @transform_3, window_bounds = array<i64: 128, 128>}]} {
    %c0 = arith.constant 0 : index
    %c0_0 = arith.constant 0 : index
    %0 = vector.load %arg1[%c0, %c0_0] : memref<128x128xbf16, #tpu.memory_space<vmem>>, vector<128x128xbf16>
    %c0_1 = arith.constant 0 : index
    %c0_2 = arith.constant 0 : index
    %1 = vector.load %arg2[%c0_1, %c0_2] : memref<128x128xbf16, #tpu.memory_space<vmem>>, vector<128x128xbf16>
    %cst = arith.constant dense<0.000000e+00> : vector<128x128xf32>
    %2 = tpu.matmul %0, %1, %cst {dimension_numbers = #tpu.dot_dimension_numbers<[1], [0], [0], [1], [0, 0, 1, 1], [], []>} : vector<128x128xbf16>, vector<128x128xbf16>, vector<128x128xf32> -> vector<128x128xf32>
    %c0_3 = arith.constant 0 : index
    %c0_4 = arith.constant 0 : index
    %3 = vector.load %arg3[%c0_3, %c0_4] : memref<1x128xf32, #tpu.memory_space<vmem>>, vector<1x128xf32>
    %4 = vector.broadcast %3 : vector<1x128xf32> to vector<128x128xf32>
    %5 = arith.addf %2, %4 : vector<128x128xf32>
    %cst_5 = arith.constant 0.000000e+00 : f32
    %6 = vector.broadcast %cst_5 : f32 to vector<128x128xf32>
    %7 = arith.maximumf %5, %6 : vector<128x128xf32>
    %8 = arith.truncf %7 : vector<128x128xf32> to vector<128x128xbf16>
    %c0_6 = arith.constant 0 : index
    %c0_7 = arith.constant 0 : index
    %9 = vector.load %arg4[%c0_6, %c0_7] : memref<128x128xbf16, #tpu.memory_space<vmem>>, vector<128x128xbf16>
    tpu.vector_store %arg4[%c0_6, %c0_7], %8 {strides = array<i32>} : memref<128x128xbf16, #tpu.memory_space<vmem>>, vector<128x128xbf16>,
    return
  }
  func.func @transform_0(%arg0: i32) -> (i32, i32) {
    %c0_i32 = arith.constant 0 : i32
    %c0_i32_0 = arith.constant 0 : i32
    return %arg0, %c0_i32 : i32, i32
  }
  func.func @transform_1(%arg0: i32) -> (i32, i32) {
    %c0_i32 = arith.constant 0 : i32
    %c0_i32_0 = arith.constant 0 : i32
    %c0_i32_1 = arith.constant 0 : i32
    return %c0_i32, %c0_i32_0 : i32, i32
  }
  func.func @transform_2(%arg0: i32) -> (i32, i32) {
    %c0_i32 = arith.constant 0 : i32
    %c0_i32_0 = arith.constant 0 : i32
    %c0_i32_1 = arith.constant 0 : i32
    return %c0_i32, %c0_i32_0 : i32, i32
  }
  func.func @transform_3(%arg0: i32) -> (i32, i32) {
    %c0_i32 = arith.constant 0 : i32
    %c0_i32_0 = arith.constant 0 : i32
    return %arg0, %c0_i32 : i32, i32
  }
}

module attributes {stable_mosaic.version = 11 : i64} {
  func.func @_agg_resident_kernel(%arg0: i32, %arg1: memref<128x128xbf16, #tpu.memory_space<vmem>>, %arg2: memref<128x128xbf16, #tpu.memory_space<vmem>>, %arg3: memref<1x128xf32, #tpu.memory_space<vmem>>, %arg4: memref<128x128xf32, #tpu.memory_space<vmem>>) attributes {dimension_semantics = [#tpu.dimension_semantics<parallel>], iteration_bounds = array<i64: 1>, scalar_prefetch = 0 : i64, scratch_operands = 0 : i64, tpu.core_type = #tpu.core_type<tc>, window_params = [{transform_indices = @transform_0, window_bounds = array<i64: 128, 128>}, {pipeline_mode = #tpu.pipeline_mode<synchronous>, transform_indices = @transform_1, window_bounds = array<i64: 128, 128>}, {pipeline_mode = #tpu.pipeline_mode<synchronous>, transform_indices = @transform_2, window_bounds = array<i64: 1, 128>}, {transform_indices = @transform_3, window_bounds = array<i64: 128, 128>}]} {
    %c0 = arith.constant 0 : index
    %c0_0 = arith.constant 0 : index
    %0 = vector.load %arg1[%c0, %c0_0] : memref<128x128xbf16, #tpu.memory_space<vmem>>, vector<128x128xbf16>
    %c0_1 = arith.constant 0 : index
    %c0_2 = arith.constant 0 : index
    %1 = vector.load %arg2[%c0_1, %c0_2] : memref<128x128xbf16, #tpu.memory_space<vmem>>, vector<128x128xbf16>
    %cst = arith.constant dense<0.000000e+00> : vector<128x128xf32>
    %2 = tpu.matmul %0, %1, %cst {dimension_numbers = #tpu.dot_dimension_numbers<[1], [0], [0], [1], [0, 0, 1, 1], [], []>} : vector<128x128xbf16>, vector<128x128xbf16>, vector<128x128xf32> -> vector<128x128xf32>
    %c0_3 = arith.constant 0 : index
    %c0_4 = arith.constant 0 : index
    %3 = vector.load %arg3[%c0_3, %c0_4] : memref<1x128xf32, #tpu.memory_space<vmem>>, vector<1x128xf32>
    %4 = vector.broadcast %3 : vector<1x128xf32> to vector<128x128xf32>
    %5 = arith.addf %2, %4 : vector<128x128xf32>
    %c0_5 = arith.constant 0 : index
    %c0_6 = arith.constant 0 : index
    %6 = vector.load %arg4[%c0_5, %c0_6] : memref<128x128xf32, #tpu.memory_space<vmem>>, vector<128x128xf32>
    tpu.vector_store %arg4[%c0_5, %c0_6], %5 {strides = array<i32>} : memref<128x128xf32, #tpu.memory_space<vmem>>, vector<128x128xf32>,
    return
  }
  func.func @transform_0(%arg0: i32) -> (i32, i32) {
    %c0_i32 = arith.constant 0 : i32
    %c0_i32_0 = arith.constant 0 : i32
    return %arg0, %c0_i32 : i32, i32
  }
  func.func @transform_1(%arg0: i32) -> (i32, i32) {
    %c0_i32 = arith.constant 0 : i32
    %c0_i32_0 = arith.constant 0 : i32
    %c0_i32_1 = arith.constant 0 : i32
    return %c0_i32, %c0_i32_0 : i32, i32
  }
  func.func @transform_2(%arg0: i32) -> (i32, i32) {
    %c0_i32 = arith.constant 0 : i32
    %c0_i32_0 = arith.constant 0 : i32
    %c0_i32_1 = arith.constant 0 : i32
    return %c0_i32, %c0_i32_0 : i32, i32
  }
  func.func @transform_3(%arg0: i32) -> (i32, i32) {
    %c0_i32 = arith.constant 0 : i32
    %c0_i32_0 = arith.constant 0 : i32
    return %arg0, %c0_i32 : i32, i32
  }
}

</mosaic_0001>

<bundles_post_ra>
// kernel: gcn_forward.4
= control target key start
LH: loop header
LB: loop body
LE: loop exit
PB: predicated region body
PF: predicated region fallthrough
CT: control target
= control target key end

     0   :  { %s583_s1 = inlined_call_operand.vmem [shape: bf16[128,128], index: 1, kind: input, shape index: {}]   ;;  %s584_s0 = inlined_call_operand.vmem [shape: bf16[128,128], index: 0, kind: input, shape index: {}]   ;;  %s585_s2 = inlined_call_operand.vmem [shape: bf16[128,128], index: 2, kind: output, shape index: {}]  }
   0x1   :  { %v480_v0 = vld [vmem:[%s583_s1] sm:$0xff]   ;;  %v481_v1 = vld [vmem:[%s583_s1 + $0x8] sm:$0xff]   ;;  %v482_v2 = vld [vmem:[%s583_s1 + $0x10] sm:$0xff]  }
   0x2   :  { %432 = vmatprep.subr.bf16.mxu0 %v480_v0  ;;  %464 = vmatprep.subr.bf16.mxu1 %v480_v0  ;;  %v483_v3 = vld [vmem:[%s583_s1 + $0x18] sm:$0xff]   ;;  %v488_v4 = vld [vmem:[%s584_s0] sm:$0xff]   ;;  %v485_v7 = vld [vmem:[%s583_s1 + $0x28] sm:$0xff]  }
   0x3   :  { %433 = vmatpush3.bf16.msra.mxu0 %v480_v0  ;;  %472 = vmatpush3.bf16.msra.mxu1 %v480_v0  ;;  %v489_v5 = vld [vmem:[%s584_s0 + $0x20] sm:$0xff]   ;;  %v486_v8 = vld [vmem:[%s583_s1 + $0x30] sm:$0xff]   ;;  %v487_v9 = vld [vmem:[%s583_s1 + $0x38] sm:$0xff]  }
   0x4   :  { %434 = vmatprep.subr.bf16.mxu0 %v481_v1  ;;  %465 = vmatprep.subr.bf16.mxu1 %v481_v1  ;;  %v484_v6 = vld [vmem:[%s583_s1 + $0x20] sm:$0xff]   ;;  %v490_v10 = vld [vmem:[%s584_s0 + $0x8] sm:$0xff]   ;;  %v492_v12 = vld [vmem:[%s584_s0 + $0x10] sm:$0xff]  }
   0x5   :  { %448 = vmatprep.mubr.bf16.mxu0 %v488_v4  ;;  %456 = vmatprep.mubr.bf16.mxu1 %v489_v5  ;;  %v491_v11 = vld [vmem:[%s584_s0 + $0x28] sm:$0xff]   ;;  %v493_v13 = vld [vmem:[%s584_s0 + $0x30] sm:$0xff]   ;;  %v494_v14 = vld [vmem:[%s584_s0 + $0x18] sm:$0xff]  }
   0x6   :  { %v495_v15 = vld [vmem:[%s584_s0 + $0x38] sm:$0xff]  }
   0x7   :  { %435 = vmatpush3.bf16.msra.mxu0 %v481_v1  ;;  %473 = vmatpush3.bf16.msra.mxu1 %v481_v1 }
   0x8   :  { %436 = vmatprep.subr.bf16.mxu0 %v482_v2  ;;  %466 = vmatprep.subr.bf16.mxu1 %v482_v2 }
   0xb   :  { %437 = vmatpush3.bf16.msra.mxu0 %v482_v2  ;;  %474 = vmatpush3.bf16.msra.mxu1 %v482_v2 }
   0xc   :  { %438 = vmatprep.subr.bf16.mxu0 %v483_v3  ;;  %467 = vmatprep.subr.bf16.mxu1 %v483_v3 }
   0xf   :  { %439 = vmatpush3.bf16.msra.mxu0 %v483_v3  ;;  %475 = vmatpush3.bf16.msra.mxu1 %v483_v3 }
  0x10   :  { %440 = vmatprep.subr.bf16.mxu0 %v484_v6  ;;  %468 = vmatprep.subr.bf16.mxu1 %v484_v6 }
  0x13   :  { %441 = vmatpush3.bf16.msra.mxu0 %v484_v6  ;;  %476 = vmatpush3.bf16.msra.mxu1 %v484_v6 }
  0x14   :  { %442 = vmatprep.subr.bf16.mxu0 %v485_v7  ;;  %469 = vmatprep.subr.bf16.mxu1 %v485_v7 }
  0x17   :  { %443 = vmatpush3.bf16.msra.mxu0 %v485_v7  ;;  %477 = vmatpush3.bf16.msra.mxu1 %v485_v7 }
  0x18   :  { %444 = vmatprep.subr.bf16.mxu0 %v486_v8  ;;  %470 = vmatprep.subr.bf16.mxu1 %v486_v8 }
  0x1b   :  { %445 = vmatpush3.bf16.msra.mxu0 %v486_v8  ;;  %478 = vmatpush3.bf16.msra.mxu1 %v486_v8 }
  0x1c   :  { %446 = vmatprep.subr.bf16.mxu0 %v487_v9  ;;  %471 = vmatprep.subr.bf16.mxu1 %v487_v9 }
  0x1f   :  { %447 = vmatpush3.bf16.msra.mxu0 %v487_v9  ;;  %479 = vmatpush3.bf16.msra.mxu1 %v487_v9 }
  0x22   :  { %449 = vmatmul.mubr.bf16.vlgmr.msra.gmra.mrb[0].mxu0 %v490_v10  ;;  %457 = vmatmul.mubr.bf16.vlgmr.msra.gmra.mrb[0].mxu1 %v491_v11 }
  0x23   :  { %452 = vmatprep.mubr.bf16.mxu0 %v492_v12  ;;  %460 = vmatprep.mubr.bf16.mxu1 %v493_v13 }
  0x2a   :  { %453 = vmatmul.mubr.bf16.gmra.mrb[4].mxu0 %v494_v14  ;;  %461 = vmatmul.mubr.bf16.gmra.mrb[4].mxu1 %v495_v15 }
  0xf5   :  { %v450_v16 = vpop.f32.mrb[0].mxu0  ;;  %v458_v17 = vpop.f32.mrb[0].mxu1 }
  0xf6   :  { %v174_v18 = vpop.f32.mrb[1].mxu0  ;;  %v206_v19 = vpop.f32.mrb[1].mxu1 }
  0xf7   :  { %v451_v20 = vpop.f32.mrb[2].mxu0  ;;  %v459_v21 = vpop.f32.mrb[2].mxu1 }
  0xf8   :  { %v377_v22 = vpack.c.bf16 %v451_v20, %v450_v16  ;;  %v397_v23 = vpack.c.bf16 %v459_v21, %v458_v17  ;;  %v177_v24 = vpop.f32.mrb[3].mxu0  ;;  %v209_v25 = vpop.f32.mrb[3].mxu1 }
  0xf9   :  { %v372_v26 = vpack.c.bf16 %v177_v24, %v174_v18  ;;  %v392_v27 = vpack.c.bf16 %v209_v25, %v206_v19 }
  0xfa   :  { %409 = vst [vmem:[%s585_s2 + $0x8] sm:$0xff] %v377_v22   ;;  %413 = vst [vmem:[%s585_s2 + $0x28] sm:$0xff] %v397_v23  }
  0xfb   :  { %373 = vst [vmem:[%s585_s2] sm:$0xff] %v372_v26   ;;  %412 = vst [vmem:[%s585_s2 + $0x20] sm:$0xff] %v392_v27  }
  0xfd   :  { %v454_v28 = vpop.f32.mrb[4].mxu0  ;;  %v462_v29 = vpop.f32.mrb[4].mxu1 }
  0xfe   :  { %v190_v30 = vpop.f32.mrb[5].mxu0  ;;  %v222_v31 = vpop.f32.mrb[5].mxu1 }
  0xff   :  { %v455_v32 = vpop.f32.mrb[6].mxu0  ;;  %v463_v33 = vpop.f32.mrb[6].mxu1 }
 0x100   :  { %v387_v34 = vpack.c.bf16 %v455_v32, %v454_v28  ;;  %v407_v35 = vpack.c.bf16 %v463_v33, %v462_v29  ;;  %v193_v36 = vpop.f32.mrb[7].mxu0  ;;  %v225_v37 = vpop.f32.mrb[7].mxu1 }
 0x101   :  { %v382_v38 = vpack.c.bf16 %v193_v36, %v190_v30  ;;  %v402_v39 = vpack.c.bf16 %v225_v37, %v222_v31 }
 0x102   :  { %411 = vst [vmem:[%s585_s2 + $0x18] sm:$0xff] %v387_v34   ;;  %415 = vst [vmem:[%s585_s2 + $0x38] sm:$0xff] %v407_v35  }
 0x103   :  { %410 = vst [vmem:[%s585_s2 + $0x10] sm:$0xff] %v382_v38   ;;  %414 = vst [vmem:[%s585_s2 + $0x30] sm:$0xff] %v402_v39  }

// kernel: gcn_forward.5
= control target key start
LH: loop header
LB: loop body
LE: loop exit
PB: predicated region body
PF: predicated region fallthrough
CT: control target
= control target key end

     0   :  { %s618_s1 = inlined_call_operand.vmem [shape: bf16[128,128], index: 1, kind: input, shape index: {}]   ;;  %s619_s0 = inlined_call_operand.vmem [shape: bf16[128,128], index: 0, kind: input, shape index: {}]   ;;  %s620_s2 = inlined_call_operand.vmem [shape: f32[1,128], index: 2, kind: input, shape index: {}]   ;;  %s621_s3 = inlined_call_operand.vmem [shape: bf16[128,128], index: 3, kind: output, shape index: {}]  }
   0x1   :  { %v507_v0 = vld [vmem:[%s618_s1] sm:$0xff]   ;;  %v508_v1 = vld [vmem:[%s618_s1 + $0x8] sm:$0xff]   ;;  %v509_v2 = vld [vmem:[%s618_s1 + $0x10] sm:$0xff]  }
   0x2   :  { %459 = vmatprep.subr.bf16.mxu0 %v507_v0  ;;  %491 = vmatprep.subr.bf16.mxu1 %v507_v0  ;;  %v510_v3 = vld [vmem:[%s618_s1 + $0x18] sm:$0xff]   ;;  %v515_v4 = vld [vmem:[%s619_s0] sm:$0xff]   ;;  %v512_v7 = vld [vmem:[%s618_s1 + $0x28] sm:$0xff]  }
   0x3   :  { %460 = vmatpush3.bf16.msra.mxu0 %v507_v0  ;;  %499 = vmatpush3.bf16.msra.mxu1 %v507_v0  ;;  %v516_v5 = vld [vmem:[%s619_s0 + $0x20] sm:$0xff]   ;;  %v513_v8 = vld [vmem:[%s618_s1 + $0x30] sm:$0xff]   ;;  %v514_v9 = vld [vmem:[%s618_s1 + $0x38] sm:$0xff]  }
   0x4   :  { %461 = vmatprep.subr.bf16.mxu0 %v508_v1  ;;  %492 = vmatprep.subr.bf16.mxu1 %v508_v1  ;;  %v511_v6 = vld [vmem:[%s618_s1 + $0x20] sm:$0xff]   ;;  %v517_v10 = vld [vmem:[%s619_s0 + $0x8] sm:$0xff]   ;;  %v519_v12 = vld [vmem:[%s619_s0 + $0x10] sm:$0xff]  }
   0x5   :  { %475 = vmatprep.mubr.bf16.mxu0 %v515_v4  ;;  %483 = vmatprep.mubr.bf16.mxu1 %v516_v5  ;;  %v518_v11 = vld [vmem:[%s619_s0 + $0x28] sm:$0xff]   ;;  %v520_v13 = vld [vmem:[%s619_s0 + $0x30] sm:$0xff]   ;;  %v521_v14 = vld [vmem:[%s619_s0 + $0x18] sm:$0xff]  }
   0x6   :  { %v522_v15 = vld [vmem:[%s619_s0 + $0x38] sm:$0xff]   ;;  %v347_v16 = vld [vmem:[%s620_s2] ss:$0 sm:$0xff] }
   0x7   :  { %462 = vmatpush3.bf16.msra.mxu0 %v508_v1  ;;  %500 = vmatpush3.bf16.msra.mxu1 %v508_v1 }
   0x8   :  { %463 = vmatprep.subr.bf16.mxu0 %v509_v2  ;;  %493 = vmatprep.subr.bf16.mxu1 %v509_v2 }
   0xb   :  { %464 = vmatpush3.bf16.msra.mxu0 %v509_v2  ;;  %501 = vmatpush3.bf16.msra.mxu1 %v509_v2 }
   0xc   :  { %465 = vmatprep.subr.bf16.mxu0 %v510_v3  ;;  %494 = vmatprep.subr.bf16.mxu1 %v510_v3 }
   0xf   :  { %466 = vmatpush3.bf16.msra.mxu0 %v510_v3  ;;  %502 = vmatpush3.bf16.msra.mxu1 %v510_v3 }
  0x10   :  { %467 = vmatprep.subr.bf16.mxu0 %v511_v6  ;;  %495 = vmatprep.subr.bf16.mxu1 %v511_v6 }
  0x13   :  { %468 = vmatpush3.bf16.msra.mxu0 %v511_v6  ;;  %503 = vmatpush3.bf16.msra.mxu1 %v511_v6 }
  0x14   :  { %469 = vmatprep.subr.bf16.mxu0 %v512_v7  ;;  %496 = vmatprep.subr.bf16.mxu1 %v512_v7 }
  0x17   :  { %470 = vmatpush3.bf16.msra.mxu0 %v512_v7  ;;  %504 = vmatpush3.bf16.msra.mxu1 %v512_v7 }
  0x18   :  { %471 = vmatprep.subr.bf16.mxu0 %v513_v8  ;;  %497 = vmatprep.subr.bf16.mxu1 %v513_v8 }
  0x1b   :  { %472 = vmatpush3.bf16.msra.mxu0 %v513_v8  ;;  %505 = vmatpush3.bf16.msra.mxu1 %v513_v8 }
  0x1c   :  { %473 = vmatprep.subr.bf16.mxu0 %v514_v9  ;;  %498 = vmatprep.subr.bf16.mxu1 %v514_v9 }
  0x1f   :  { %474 = vmatpush3.bf16.msra.mxu0 %v514_v9  ;;  %506 = vmatpush3.bf16.msra.mxu1 %v514_v9 }
  0x22   :  { %476 = vmatmul.mubr.bf16.vlgmr.msra.gmra.mrb[0].mxu0 %v517_v10  ;;  %484 = vmatmul.mubr.bf16.vlgmr.msra.gmra.mrb[0].mxu1 %v518_v11 }
  0x23   :  { %479 = vmatprep.mubr.bf16.mxu0 %v519_v12  ;;  %487 = vmatprep.mubr.bf16.mxu1 %v520_v13 }
  0x2a   :  { %480 = vmatmul.mubr.bf16.gmra.mrb[4].mxu0 %v521_v14  ;;  %488 = vmatmul.mubr.bf16.gmra.mrb[4].mxu1 %v522_v15 }
  0xf5   :  { %v477_v17 = vpop.f32.mrb[0].mxu0  ;;  %v485_v18 = vpop.f32.mrb[0].mxu1 }
  0xf6   :  { %v193_v19 = vadd.f32 %v477_v17, %v347_v16  ;;  %v225_v20 = vadd.f32 %v485_v18, %v347_v16  ;;  %v184_v21 = vpop.f32.mrb[1].mxu0  ;;  %v216_v22 = vpop.f32.mrb[1].mxu1 }
  0xf7   :  { %v185_v23 = vadd.f32 %v347_v16, %v184_v21  ;;  %v217_v24 = vadd.f32 %v347_v16, %v216_v22  ;;  %v478_v25 = vpop.f32.mrb[2].mxu0  ;;  %v486_v26 = vpop.f32.mrb[2].mxu1 }
  0xf8   :  { %v196_v27 = vadd.f32 %v478_v25, %v347_v16  ;;  %v228_v28 = vadd.f32 %v486_v26, %v347_v16  ;;  %v187_v29 = vpop.f32.mrb[3].mxu0  ;;  %v219_v30 = vpop.f32.mrb[3].mxu1  ;;  %v249_v33 = vmax.f32 %v193_v19, 0.0  ;;  %v257_v34 = vmax.f32 %v225_v20, 0.0 }
  0xf9   :  { %v188_v31 = vadd.f32 %v347_v16, %v187_v29  ;;  %v220_v32 = vadd.f32 %v347_v16, %v219_v30  ;;  %v247_v37 = vmax.f32 %v185_v23, 0.0  ;;  %v255_v38 = vmax.f32 %v217_v24, 0.0 }
  0xfa   :  { %v250_v35 = vmax.f32 %v196_v27, 0.0  ;;  %v258_v36 = vmax.f32 %v228_v28, 0.0 }
  0xfb   :  { %v248_v39 = vmax.f32 %v188_v31, 0.0  ;;  %v256_v40 = vmax.f32 %v220_v32, 0.0 }
  0xfc   :  { %v404_v41 = vpack.c.bf16 %v250_v35, %v249_v33  ;;  %v424_v42 = vpack.c.bf16 %v258_v36, %v257_v34 }
  0xfd   :  { %v399_v43 = vpack.c.bf16 %v248_v39, %v247_v37  ;;  %v419_v44 = vpack.c.bf16 %v256_v40, %v255_v38  ;;  %v481_v45 = vpop.f32.mrb[4].mxu0  ;;  %v489_v46 = vpop.f32.mrb[4].mxu1 }
  0xfe   :  { %436 = vst [vmem:[%s621_s3 + $0x8] sm:$0xff] %v404_v41   ;;  %440 = vst [vmem:[%s621_s3 + $0x28] sm:$0xff] %v424_v42   ;;  %v209_v47 = vadd.f32 %v481_v45, %v347_v16  ;;  %v241_v48 = vadd.f32 %v489_v46, %v347_v16  ;;  %v200_v49 = vpop.f32.mrb[5].mxu0  ;;  %v232_v50 = vpop.f32.mrb[5].mxu1 }
  0xff   :  { %400 = vst [vmem:[%s621_s3] sm:$0xff] %v399_v43   ;;  %439 = vst [vmem:[%s621_s3 + $0x20] sm:$0xff] %v419_v44   ;;  %v201_v51 = vadd.f32 %v347_v16, %v200_v49  ;;  %v233_v52 = vadd.f32 %v347_v16, %v232_v50  ;;  %v482_v53 = vpop.f32.mrb[6].mxu0  ;;  %v490_v54 = vpop.f32.mrb[6].mxu1 }
 0x100   :  { %v212_v55 = vadd.f32 %v482_v53, %v347_v16  ;;  %v244_v56 = vadd.f32 %v490_v54, %v347_v16  ;;  %v203_v57 = vpop.f32.mrb[7].mxu0  ;;  %v235_v58 = vpop.f32.mrb[7].mxu1  ;;  %v253_v61 = vmax.f32 %v209_v47, 0.0  ;;  %v261_v62 = vmax.f32 %v241_v48, 0.0 }
 0x101   :  { %v204_v59 = vadd.f32 %v347_v16, %v203_v57  ;;  %v236_v60 = vadd.f32 %v347_v16, %v235_v58  ;;  %v251_v1 = vmax.f32 %v201_v51, 0.0  ;;  %v259_v2 = vmax.f32 %v233_v52, 0.0 }
 0x102   :  { %v254_v63 = vmax.f32 %v212_v55, 0.0  ;;  %v262_v0 = vmax.f32 %v244_v56, 0.0 }
 0x103   :  { %v252_v3 = vmax.f32 %v204_v59, 0.0  ;;  %v260_v4 = vmax.f32 %v236_v60, 0.0 }
 0x104   :  { %v414_v5 = vpack.c.bf16 %v254_v63, %v253_v61  ;;  %v434_v6 = vpack.c.bf16 %v262_v0, %v261_v62 }
 0x105   :  { %v409_v7 = vpack.c.bf16 %v252_v3, %v251_v1  ;;  %v429_v8 = vpack.c.bf16 %v260_v4, %v259_v2 }
 0x106   :  { %438 = vst [vmem:[%s621_s3 + $0x18] sm:$0xff] %v414_v5   ;;  %442 = vst [vmem:[%s621_s3 + $0x38] sm:$0xff] %v434_v6  }
 0x107   :  { %437 = vst [vmem:[%s621_s3 + $0x10] sm:$0xff] %v409_v7   ;;  %441 = vst [vmem:[%s621_s3 + $0x30] sm:$0xff] %v429_v8  }

// kernel: gcn_forward.7
= control target key start
LH: loop header
LB: loop body
LE: loop exit
PB: predicated region body
PF: predicated region fallthrough
CT: control target
= control target key end

     0   :  { %s483_s1 = inlined_call_operand.vmem [shape: bf16[128,128], index: 1, kind: input, shape index: {}]   ;;  %s484_s0 = inlined_call_operand.vmem [shape: bf16[128,128], index: 0, kind: input, shape index: {}]   ;;  %s485_s2 = inlined_call_operand.vmem [shape: f32[1,128], index: 2, kind: input, shape index: {}]   ;;  %s486_s3 = inlined_call_operand.vmem [shape: f32[128,128], index: 3, kind: output, shape index: {}]  }
   0x1   :  { %v348_v0 = vld [vmem:[%s483_s1] sm:$0xff]   ;;  %v349_v1 = vld [vmem:[%s483_s1 + $0x8] sm:$0xff]   ;;  %v350_v2 = vld [vmem:[%s483_s1 + $0x10] sm:$0xff]  }
   0x2   :  { %300 = vmatprep.subr.bf16.mxu0 %v348_v0  ;;  %332 = vmatprep.subr.bf16.mxu1 %v348_v0  ;;  %v351_v3 = vld [vmem:[%s483_s1 + $0x18] sm:$0xff]   ;;  %v356_v4 = vld [vmem:[%s484_s0] sm:$0xff]   ;;  %v353_v7 = vld [vmem:[%s483_s1 + $0x28] sm:$0xff]  }
   0x3   :  { %301 = vmatpush3.bf16.msra.mxu0 %v348_v0  ;;  %340 = vmatpush3.bf16.msra.mxu1 %v348_v0  ;;  %v357_v5 = vld [vmem:[%s484_s0 + $0x20] sm:$0xff]   ;;  %v354_v8 = vld [vmem:[%s483_s1 + $0x30] sm:$0xff]   ;;  %v355_v9 = vld [vmem:[%s483_s1 + $0x38] sm:$0xff]  }
   0x4   :  { %302 = vmatprep.subr.bf16.mxu0 %v349_v1  ;;  %333 = vmatprep.subr.bf16.mxu1 %v349_v1  ;;  %v352_v6 = vld [vmem:[%s483_s1 + $0x20] sm:$0xff]   ;;  %v358_v10 = vld [vmem:[%s484_s0 + $0x8] sm:$0xff]   ;;  %v360_v12 = vld [vmem:[%s484_s0 + $0x10] sm:$0xff]  }
   0x5   :  { %316 = vmatprep.mubr.bf16.mxu0 %v356_v4  ;;  %324 = vmatprep.mubr.bf16.mxu1 %v357_v5  ;;  %v359_v11 = vld [vmem:[%s484_s0 + $0x28] sm:$0xff]   ;;  %v361_v13 = vld [vmem:[%s484_s0 + $0x30] sm:$0xff]   ;;  %v362_v14 = vld [vmem:[%s484_s0 + $0x18] sm:$0xff]  }
   0x6   :  { %v363_v15 = vld [vmem:[%s484_s0 + $0x38] sm:$0xff]   ;;  %v267_v16 = vld [vmem:[%s485_s2] ss:$0 sm:$0xff] }
   0x7   :  { %303 = vmatpush3.bf16.msra.mxu0 %v349_v1  ;;  %341 = vmatpush3.bf16.msra.mxu1 %v349_v1 }
   0x8   :  { %304 = vmatprep.subr.bf16.mxu0 %v350_v2  ;;  %334 = vmatprep.subr.bf16.mxu1 %v350_v2 }
   0xb   :  { %305 = vmatpush3.bf16.msra.mxu0 %v350_v2  ;;  %342 = vmatpush3.bf16.msra.mxu1 %v350_v2 }
   0xc   :  { %306 = vmatprep.subr.bf16.mxu0 %v351_v3  ;;  %335 = vmatprep.subr.bf16.mxu1 %v351_v3 }
   0xf   :  { %307 = vmatpush3.bf16.msra.mxu0 %v351_v3  ;;  %343 = vmatpush3.bf16.msra.mxu1 %v351_v3 }
  0x10   :  { %308 = vmatprep.subr.bf16.mxu0 %v352_v6  ;;  %336 = vmatprep.subr.bf16.mxu1 %v352_v6 }
  0x13   :  { %309 = vmatpush3.bf16.msra.mxu0 %v352_v6  ;;  %344 = vmatpush3.bf16.msra.mxu1 %v352_v6 }
  0x14   :  { %310 = vmatprep.subr.bf16.mxu0 %v353_v7  ;;  %337 = vmatprep.subr.bf16.mxu1 %v353_v7 }
  0x17   :  { %311 = vmatpush3.bf16.msra.mxu0 %v353_v7  ;;  %345 = vmatpush3.bf16.msra.mxu1 %v353_v7 }
  0x18   :  { %312 = vmatprep.subr.bf16.mxu0 %v354_v8  ;;  %338 = vmatprep.subr.bf16.mxu1 %v354_v8 }
  0x1b   :  { %313 = vmatpush3.bf16.msra.mxu0 %v354_v8  ;;  %346 = vmatpush3.bf16.msra.mxu1 %v354_v8 }
  0x1c   :  { %314 = vmatprep.subr.bf16.mxu0 %v355_v9  ;;  %339 = vmatprep.subr.bf16.mxu1 %v355_v9 }
  0x1f   :  { %315 = vmatpush3.bf16.msra.mxu0 %v355_v9  ;;  %347 = vmatpush3.bf16.msra.mxu1 %v355_v9 }
  0x22   :  { %317 = vmatmul.mubr.bf16.vlgmr.msra.gmra.mrb[0].mxu0 %v358_v10  ;;  %325 = vmatmul.mubr.bf16.vlgmr.msra.gmra.mrb[0].mxu1 %v359_v11 }
  0x23   :  { %320 = vmatprep.mubr.bf16.mxu0 %v360_v12  ;;  %328 = vmatprep.mubr.bf16.mxu1 %v361_v13 }
  0x2a   :  { %321 = vmatmul.mubr.bf16.gmra.mrb[4].mxu0 %v362_v14  ;;  %329 = vmatmul.mubr.bf16.gmra.mrb[4].mxu1 %v363_v15 }
  0xf5   :  { %v318_v17 = vpop.f32.mrb[0].mxu0  ;;  %v326_v18 = vpop.f32.mrb[0].mxu1 }
  0xf6   :  { %v193_v19 = vadd.f32 %v318_v17, %v267_v16  ;;  %v225_v20 = vadd.f32 %v326_v18, %v267_v16  ;;  %v184_v21 = vpop.f32.mrb[1].mxu0  ;;  %v216_v22 = vpop.f32.mrb[1].mxu1 }
  0xf7   :  { %v185_v23 = vadd.f32 %v267_v16, %v184_v21  ;;  %v217_v24 = vadd.f32 %v267_v16, %v216_v22  ;;  %v319_v25 = vpop.f32.mrb[2].mxu0  ;;  %v327_v26 = vpop.f32.mrb[2].mxu1 }
  0xf8   :  { %249 = vst [vmem:[%s486_s3 + $0x10] sm:$0xff] %v193_v19  ;;  %257 = vst [vmem:[%s486_s3 + $0x50] sm:$0xff] %v225_v20  ;;  %v196_v27 = vadd.f32 %v319_v25, %v267_v16  ;;  %v228_v28 = vadd.f32 %v327_v26, %v267_v16  ;;  %v187_v29 = vpop.f32.mrb[3].mxu0  ;;  %v219_v30 = vpop.f32.mrb[3].mxu1 }
  0xf9   :  { %247 = vst [vmem:[%s486_s3] sm:$0xff] %v185_v23  ;;  %255 = vst [vmem:[%s486_s3 + $0x40] sm:$0xff] %v217_v24  ;;  %v188_v31 = vadd.f32 %v267_v16, %v187_v29  ;;  %v220_v32 = vadd.f32 %v267_v16, %v219_v30 }
  0xfa   :  { %250 = vst [vmem:[%s486_s3 + $0x18] sm:$0xff] %v196_v27  ;;  %258 = vst [vmem:[%s486_s3 + $0x58] sm:$0xff] %v228_v28 }
  0xfb   :  { %248 = vst [vmem:[%s486_s3 + $0x8] sm:$0xff] %v188_v31  ;;  %256 = vst [vmem:[%s486_s3 + $0x48] sm:$0xff] %v220_v32 }
  0xfd   :  { %v322_v33 = vpop.f32.mrb[4].mxu0  ;;  %v330_v34 = vpop.f32.mrb[4].mxu1 }
  0xfe   :  { %v209_v35 = vadd.f32 %v322_v33, %v267_v16  ;;  %v241_v36 = vadd.f32 %v330_v34, %v267_v16  ;;  %v200_v37 = vpop.f32.mrb[5].mxu0  ;;  %v232_v38 = vpop.f32.mrb[5].mxu1 }
  0xff   :  { %v201_v39 = vadd.f32 %v267_v16, %v200_v37  ;;  %v233_v40 = vadd.f32 %v267_v16, %v232_v38  ;;  %v323_v41 = vpop.f32.mrb[6].mxu0  ;;  %v331_v42 = vpop.f32.mrb[6].mxu1 }
 0x100   :  { %253 = vst [vmem:[%s486_s3 + $0x30] sm:$0xff] %v209_v35  ;;  %261 = vst [vmem:[%s486_s3 + $0x70] sm:$0xff] %v241_v36  ;;  %v212_v43 = vadd.f32 %v323_v41, %v267_v16  ;;  %v244_v44 = vadd.f32 %v331_v42, %v267_v16  ;;  %v203_v45 = vpop.f32.mrb[7].mxu0  ;;  %v235_v46 = vpop.f32.mrb[7].mxu1 }
 0x101   :  { %251 = vst [vmem:[%s486_s3 + $0x20] sm:$0xff] %v201_v39  ;;  %259 = vst [vmem:[%s486_s3 + $0x60] sm:$0xff] %v233_v40  ;;  %v204_v47 = vadd.f32 %v267_v16, %v203_v45  ;;  %v236_v48 = vadd.f32 %v267_v16, %v235_v46 }
 0x102   :  { %254 = vst [vmem:[%s486_s3 + $0x38] sm:$0xff] %v212_v43  ;;  %262 = vst [vmem:[%s486_s3 + $0x78] sm:$0xff] %v244_v44 }
 0x103   :  { %252 = vst [vmem:[%s486_s3 + $0x28] sm:$0xff] %v204_v47  ;;  %260 = vst [vmem:[%s486_s3 + $0x68] sm:$0xff] %v236_v48 }

</bundles_post_ra>
